<compile_context>
chip_gen: v7x
topology: tpu7x:2x2x1
jax: 0.10.0
libtpu: 0.0.40
codegen_flags: <defaults>
</compile_context>

<pallas_src>
import functools
import math

import jax
import jax.numpy as jnp
from jax.experimental import pallas as pl
from jax.experimental.pallas import tpu as pltpu


def _round_up(x, m):
    return ((x + m - 1) // m) * m


# ----------------------------- Pallas kernel -------------------------------
def _time_embed_kernel(t_ref, w1_ref, b1_ref, w2_ref, b2_ref, o_ref, *,
                       half_dim, neg_scale):
    # t_ref : (TM, 1)   f32 timesteps for this row tile
    # w1_ref: (D1p, Cp) lin1 weight in (in, out) layout, zero padded
    # b1_ref: (1, Cp)
    # w2_ref: (Cp, Cp)  lin2 weight in (in, out) layout, zero padded
    # b2_ref: (1, Cp)
    # o_ref : (TM, Cp)  lane-dense, unmasked stores
    d1p = w1_ref.shape[0]

    # Sinusoidal features built lane-dense in VMEM/vregs (no HBM trip).
    col = jax.lax.broadcasted_iota(jnp.int32, (1, d1p), 1)
    is_sin = col < half_dim
    k = jnp.where(is_sin, col, col - half_dim).astype(jnp.float32)
    freq = jnp.exp(k * neg_scale)                        # EUP exp
    ang = t_ref[...] * freq                              # (TM, D1p) broadcast
    emb = jnp.where(is_sin, jnp.sin(ang), jnp.cos(ang))  # EUP sin/cos
    # Columns >= C//4 contain finite junk but hit zero rows of w1 -> no-op.

    h = jnp.dot(emb, w1_ref[...],
                preferred_element_type=jnp.float32) + b1_ref[...]
    h = h * jax.nn.sigmoid(h)                            # Swish, stays in VMEM
    out = jnp.dot(h, w2_ref[...],
                  preferred_element_type=jnp.float32) + b2_ref[...]
    o_ref[...] = out.astype(o_ref.dtype)


# ----------------------- one-time parameter preparation ---------------------
def prepare_time_embedding_params(w1, b1, w2, b2):
    """Hoisted out of the per-call path: transpose + lane-dense zero padding.

    w1: (C, C//4) PyTorch lin1.weight (out, in); b1: (C,)
    w2: (C, C)    PyTorch lin2.weight (out, in); b2: (C,)
    Returns (w1_p, b1_p, w2_p, b2_p) with D1p = round_up(C//4, 128),
    Cp = round_up(C, 128). Call once at init, not per forward.
    """
    C, D1 = w1.shape
    D1p = _round_up(D1, 128)
    Cp = _round_up(C, 128)
    w1_p = jnp.zeros((D1p, Cp), jnp.float32).at[:D1, :C].set(
        jnp.asarray(w1, jnp.float32).T)
    b1_p = jnp.zeros((1, Cp), jnp.float32).at[0, :C].set(
        jnp.asarray(b1, jnp.float32))
    w2_p = jnp.zeros((Cp, Cp), jnp.float32).at[:C, :C].set(
        jnp.asarray(w2, jnp.float32).T)
    b2_p = jnp.zeros((1, Cp), jnp.float32).at[0, :C].set(
        jnp.asarray(b2, jnp.float32))
    return w1_p, b1_p, w2_p, b2_p


# ------------------------------- forward ------------------------------------
def make_time_embedding_forward(n_channels, *, single_buffer_weights=True,
                                max_tm=1024):
    half_dim = n_channels // 8
    # Guard n_channels == 8 (half_dim == 1): PyTorch would divide by zero.
    neg_scale = -math.log(10000.0) / max(half_dim - 1, 1)
    kernel = functools.partial(_time_embed_kernel,
                               half_dim=half_dim, neg_scale=neg_scale)

    @jax.jit
    def forward(t, w1_p, b1_p, w2_p, b2_p):
        B = t.shape[0]
        D1p, Cp = w1_p.shape

        # Row tile: >= 2 grid steps for B >= 128 (engage both v7x TCs),
        # single tiny step for small B, capped at max_tm for v5e/v6e batches.
        if B >= 128:
            tm = _round_up(pl.cdiv(B, 2), 8)
        else:
            tm = _round_up(B, 8)
        tm = min(tm, max_tm)
        Bp = _round_up(B, tm)

        t_col = jnp.zeros((Bp, 1), jnp.float32).at[:B, 0].set(
            t.astype(jnp.float32))

        def const_spec(shape):
            # Grid-invariant operand: constant index map; single-buffer it.
            if single_buffer_weights:
                return pl.BlockSpec(shape, lambda i: (0, 0),
                                    pipeline_mode=pl.Buffered(1))
            return pl.BlockSpec(shape, lambda i: (0, 0))

        # Only pin vmem_limit_bytes when the (Cp, Cp) weight could crowd the
        # 32 MiB scoped default (relevant on v7x for large n_channels).
        wbuf = 1 if single_buffer_weights else 2
        vmem_bytes = 4 * (2 * tm * (1 + Cp)                       # t + out (dbl buf)
                          + wbuf * (D1p * Cp + Cp * Cp + 2 * Cp)  # weights/biases
                          + tm * (D1p + 2 * Cp))                  # in-kernel temps
        cp_kwargs = {"dimension_semantics": ("parallel",)}
        if vmem_bytes > (24 << 20):
            cp_kwargs["vmem_limit_bytes"] = min(vmem_bytes + (8 << 20), 64 << 20)

        out = pl.pallas_call(
            kernel,
            out_shape=jax.ShapeDtypeStruct((Bp, Cp), jnp.float32),
            grid_spec=pltpu.PrefetchScalarGridSpec(
                num_scalar_prefetch=0,
                grid=(Bp // tm,),
                in_specs=[
                    pl.BlockSpec((tm, 1), lambda i: (i, 0)),
                    const_spec((D1p, Cp)),
                    const_spec((1, Cp)),
                    const_spec((Cp, Cp)),
                    const_spec((1, Cp)),
                ],
                out_specs=pl.BlockSpec((tm, Cp), lambda i: (i, 0)),
            ),
            compiler_params=pltpu.CompilerParams(**cp_kwargs),
        )(t_col, w1_p, b1_p, w2_p, b2_p)

        if Bp == B and Cp == n_channels:
            return out
        return out[:B, :n_channels]

    return forward


# ------------------------------ reference ------------------------------------
def _reference(t, w1, b1, w2, b2):
    C = w1.shape[0]
    half_dim = C // 8
    scale = math.log(10000.0) / max(half_dim - 1, 1)
    freq = jnp.exp(jnp.arange(half_dim, dtype=jnp.float32) * -scale)
    ang = t.astype(jnp.float32)[:, None] * freq[None, :]
    emb = jnp.concatenate([jnp.sin(ang), jnp.cos(ang)], axis=1)
    h = jnp.dot(emb, w1.T, precision=jax.lax.Precision.HIGHEST) + b1
    h = h * jax.nn.sigmoid(h)
    return jnp.dot(h, w2.T, precision=jax.lax.Precision.HIGHEST) + b2


# --------------------------------- main ---------------------------------------
if __name__ == "__main__":
    key = jax.random.PRNGKey(0)
    k1, k2, k3, k4 = jax.random.split(key, 4)

    # Small shapes consistent with the module: batch=2 timesteps, hidden=32.
    B, C = 2, 32
    D1 = C // 4

    t = jnp.array([50, 125], dtype=jnp.int32)

    # nn.Linear default init: U(-1/sqrt(fan_in), 1/sqrt(fan_in)).
    b1_bound = 1.0 / math.sqrt(D1)
    b2_bound = 1.0 / math.sqrt(C)
    w1 = jax.random.uniform(k1, (C, D1), jnp.float32, -b1_bound, b1_bound)
    b1 = jax.random.uniform(k2, (C,), jnp.float32, -b1_bound, b1_bound)
    w2 = jax.random.uniform(k3, (C, C), jnp.float32, -b2_bound, b2_bound)
    b2 = jax.random.uniform(k4, (C,), jnp.float32, -b2_bound, b2_bound)

    padded = prepare_time_embedding_params(w1, b1, w2, b2)  # once, not per call

    try:
        fwd = make_time_embedding_forward(C, single_buffer_weights=True)
        out = jax.block_until_ready(fwd(t, *padded))
    except Exception:
        # TODO(synk): pl.Buffered(1) rejected on this jax build; retry with
        # default double-buffered weight specs (identical semantics).
        fwd = make_time_embedding_forward(C, single_buffer_weights=False)
        out = jax.block_until_ready(fwd(t, *padded))

    ref = _reference(t, w1, b1, w2, b2)
    assert out.shape == (B, C), out.shape
    max_err = float(jnp.max(jnp.abs(out - ref)))
    assert jnp.allclose(out, ref, atol=1e-3, rtol=1e-3), (
        "mismatch vs reference, max abs err = %g" % max_err)

    print("KERNEL_OK")
</pallas_src>

<mosaic_0001>
module attributes {stable_mosaic.version = 11 : i64} {
  func.func @_time_embed_kernel(%arg0: i32, %arg1: memref<8x1xf32, #tpu.memory_space<vmem>>, %arg2: memref<128x128xf32, #tpu.memory_space<vmem>>, %arg3: memref<1x128xf32, #tpu.memory_space<vmem>>, %arg4: memref<128x128xf32, #tpu.memory_space<vmem>>, %arg5: memref<1x128xf32, #tpu.memory_space<vmem>>, %arg6: memref<8x128xf32, #tpu.memory_space<vmem>>) attributes {dimension_semantics = [#tpu.dimension_semantics<parallel>], iteration_bounds = array<i64: 1>, scalar_prefetch = 0 : i64, scratch_operands = 0 : i64, tpu.core_type = #tpu.core_type<tc>, window_params = [{transform_indices = @transform_0, window_bounds = array<i64: 8, 1>}, {pipeline_mode = #tpu.pipeline_mode<synchronous>, transform_indices = @transform_1, window_bounds = array<i64: 128, 128>}, {pipeline_mode = #tpu.pipeline_mode<synchronous>, transform_indices = @transform_2, window_bounds = array<i64: 1, 128>}, {pipeline_mode = #tpu.pipeline_mode<synchronous>, transform_indices = @transform_3, window_bounds = array<i64: 128, 128>}, {pipeline_mode = #tpu.pipeline_mode<synchronous>, transform_indices = @transform_4, window_bounds = array<i64: 1, 128>}, {transform_indices = @transform_5, window_bounds = array<i64: 8, 128>}]} {
    %0 = tpu.iota {dimensions = array<i32: 1>} : vector<1x128xi32>
    %c4_i32 = arith.constant 4 : i32
    %1 = vector.broadcast %c4_i32 : i32 to vector<1x128xi32>
    %2 = arith.cmpi slt, %0, %1 : vector<1x128xi32>
    %c4_i32_0 = arith.constant 4 : i32
    %3 = vector.broadcast %c4_i32_0 : i32 to vector<1x128xi32>
    %4 = arith.subi %0, %3 : vector<1x128xi32>
    %5 = arith.select %2, %0, %4 : vector<1x128xi1>, vector<1x128xi32>
    %6 = arith.sitofp %5 : vector<1x128xi32> to vector<1x128xf32>
    %cst = arith.constant -3.07011342 : f32
    %7 = vector.broadcast %cst : f32 to vector<1x128xf32>
    %8 = arith.mulf %6, %7 : vector<1x128xf32>
    %9 = math.exp %8 : vector<1x128xf32>
    %c0 = arith.constant 0 : index
    %c0_1 = arith.constant 0 : index
    %10 = vector.load %arg1[%c0, %c0_1] : memref<8x1xf32, #tpu.memory_space<vmem>>, vector<8x1xf32>
    %11 = vector.broadcast %10 : vector<8x1xf32> to vector<8x128xf32>
    %12 = vector.broadcast %9 : vector<1x128xf32> to vector<8x128xf32>
    %13 = arith.mulf %11, %12 : vector<8x128xf32>
    %14 = math.sin %13 : vector<8x128xf32>
    %15 = math.cos %13 : vector<8x128xf32>
    %16 = vector.shape_cast %2 : vector<1x128xi1> to vector<1x128xi1>
    %17 = vector.broadcast %16 : vector<1x128xi1> to vector<8x128xi1>
    %18 = arith.select %17, %14, %15 : vector<8x128xi1>, vector<8x128xf32>
    %c0_2 = arith.constant 0 : index
    %c0_3 = arith.constant 0 : index
    %19 = vector.load %arg2[%c0_2, %c0_3] : memref<128x128xf32, #tpu.memory_space<vmem>>, vector<128x128xf32>
    %cst_4 = arith.constant dense<0.000000e+00> : vector<8x128xf32>
    %20 = tpu.matmul %18, %19, %cst_4 {dimension_numbers = #tpu.dot_dimension_numbers<[1], [0], [0], [1], [0, 0, 1, 1], [], []>} : vector<8x128xf32>, vector<128x128xf32>, vector<8x128xf32> -> vector<8x128xf32>
    %c0_5 = arith.constant 0 : index
    %c0_6 = arith.constant 0 : index
    %21 = vector.load %arg3[%c0_5, %c0_6] : memref<1x128xf32, #tpu.memory_space<vmem>>, vector<1x128xf32>
    %22 = vector.broadcast %21 : vector<1x128xf32> to vector<8x128xf32>
    %23 = arith.addf %20, %22 : vector<8x128xf32>
    %24 = arith.negf %23 : vector<8x128xf32>
    %25 = math.exp %24 : vector<8x128xf32>
    %cst_7 = arith.constant 1.000000e+00 : f32
    %26 = vector.broadcast %cst_7 : f32 to vector<8x128xf32>
    %27 = arith.addf %26, %25 : vector<8x128xf32>
    %28 = arith.divf %26, %27 : vector<8x128xf32>
    %29 = arith.mulf %23, %28 : vector<8x128xf32>
    %c0_8 = arith.constant 0 : index
    %c0_9 = arith.constant 0 : index
    %30 = vector.load %arg4[%c0_8, %c0_9] : memref<128x128xf32, #tpu.memory_space<vmem>>, vector<128x128xf32>
    %cst_10 = arith.constant dense<0.000000e+00> : vector<8x128xf32>
    %31 = tpu.matmul %29, %30, %cst_10 {dimension_numbers = #tpu.dot_dimension_numbers<[1], [0], [0], [1], [0, 0, 1, 1], [], []>} : vector<8x128xf32>, vector<128x128xf32>, vector<8x128xf32> -> vector<8x128xf32>
    %c0_11 = arith.constant 0 : index
    %c0_12 = arith.constant 0 : index
    %32 = vector.load %arg5[%c0_11, %c0_12] : memref<1x128xf32, #tpu.memory_space<vmem>>, vector<1x128xf32>
    %33 = vector.broadcast %32 : vector<1x128xf32> to vector<8x128xf32>
    %34 = arith.addf %31, %33 : vector<8x128xf32>
    %c0_13 = arith.constant 0 : index
    %c0_14 = arith.constant 0 : index
    %35 = vector.load %arg6[%c0_13, %c0_14] : memref<8x128xf32, #tpu.memory_space<vmem>>, vector<8x128xf32>
    tpu.vector_store %arg6[%c0_13, %c0_14], %34 {strides = array<i32>} : memref<8x128xf32, #tpu.memory_space<vmem>>, vector<8x128xf32>,
    return
  }
  func.func @transform_0(%arg0: i32) -> (i32, i32) {
    %c0_i32 = arith.constant 0 : i32
    %c0_i32_0 = arith.constant 0 : i32
    return %arg0, %c0_i32 : i32, i32
  }
  func.func @transform_1(%arg0: i32) -> (i32, i32) {
    %c0_i32 = arith.constant 0 : i32
    %c0_i32_0 = arith.constant 0 : i32
    %c0_i32_1 = arith.constant 0 : i32
    return %c0_i32, %c0_i32_0 : i32, i32
  }
  func.func @transform_2(%arg0: i32) -> (i32, i32) {
    %c0_i32 = arith.constant 0 : i32
    %c0_i32_0 = arith.constant 0 : i32
    %c0_i32_1 = arith.constant 0 : i32
    return %c0_i32, %c0_i32_0 : i32, i32
  }
  func.func @transform_3(%arg0: i32) -> (i32, i32) {
    %c0_i32 = arith.constant 0 : i32
    %c0_i32_0 = arith.constant 0 : i32
    %c0_i32_1 = arith.constant 0 : i32
    return %c0_i32, %c0_i32_0 : i32, i32
  }
  func.func @transform_4(%arg0: i32) -> (i32, i32) {
    %c0_i32 = arith.constant 0 : i32
    %c0_i32_0 = arith.constant 0 : i32
    %c0_i32_1 = arith.constant 0 : i32
    return %c0_i32, %c0_i32_0 : i32, i32
  }
  func.func @transform_5(%arg0: i32) -> (i32, i32) {
    %c0_i32 = arith.constant 0 : i32
    %c0_i32_0 = arith.constant 0 : i32
    return %arg0, %c0_i32 : i32, i32
  }
}

module attributes {stable_mosaic.version = 11 : i64} {
  func.func @_time_embed_kernel(%arg0: i32, %arg1: memref<8x1xf32, #tpu.memory_space<vmem>>, %arg2: memref<128x128xf32, #tpu.memory_space<vmem>>, %arg3: memref<1x128xf32, #tpu.memory_space<vmem>>, %arg4: memref<128x128xf32, #tpu.memory_space<vmem>>, %arg5: memref<1x128xf32, #tpu.memory_space<vmem>>, %arg6: memref<8x128xf32, #tpu.memory_space<vmem>>) attributes {dimension_semantics = [#tpu.dimension_semantics<parallel>], iteration_bounds = array<i64: 1>, scalar_prefetch = 0 : i64, scratch_operands = 0 : i64, tpu.core_type = #tpu.core_type<tc>, window_params = [{transform_indices = @transform_0, window_bounds = array<i64: 8, 1>}, {pipeline_mode = #tpu.pipeline_mode<synchronous>, transform_indices = @transform_1, window_bounds = array<i64: 128, 128>}, {pipeline_mode = #tpu.pipeline_mode<synchronous>, transform_indices = @transform_2, window_bounds = array<i64: 1, 128>}, {pipeline_mode = #tpu.pipeline_mode<synchronous>, transform_indices = @transform_3, window_bounds = array<i64: 128, 128>}, {pipeline_mode = #tpu.pipeline_mode<synchronous>, transform_indices = @transform_4, window_bounds = array<i64: 1, 128>}, {transform_indices = @transform_5, window_bounds = array<i64: 8, 128>}]} {
    %0 = tpu.iota {dimensions = array<i32: 1>} : vector<1x128xi32>
    %c4_i32 = arith.constant 4 : i32
    %1 = vector.broadcast %c4_i32 : i32 to vector<1x128xi32>
    %2 = arith.cmpi slt, %0, %1 : vector<1x128xi32>
    %c4_i32_0 = arith.constant 4 : i32
    %3 = vector.broadcast %c4_i32_0 : i32 to vector<1x128xi32>
    %4 = arith.subi %0, %3 : vector<1x128xi32>
    %5 = arith.select %2, %0, %4 : vector<1x128xi1>, vector<1x128xi32>
    %6 = arith.sitofp %5 : vector<1x128xi32> to vector<1x128xf32>
    %cst = arith.constant -3.07011342 : f32
    %7 = vector.broadcast %cst : f32 to vector<1x128xf32>
    %8 = arith.mulf %6, %7 : vector<1x128xf32>
    %9 = math.exp %8 : vector<1x128xf32>
    %c0 = arith.constant 0 : index
    %c0_1 = arith.constant 0 : index
    %10 = vector.load %arg1[%c0, %c0_1] : memref<8x1xf32, #tpu.memory_space<vmem>>, vector<8x1xf32>
    %11 = vector.broadcast %10 : vector<8x1xf32> to vector<8x128xf32>
    %12 = vector.broadcast %9 : vector<1x128xf32> to vector<8x128xf32>
    %13 = arith.mulf %11, %12 : vector<8x128xf32>
    %14 = math.sin %13 : vector<8x128xf32>
    %15 = math.cos %13 : vector<8x128xf32>
    %16 = vector.shape_cast %2 : vector<1x128xi1> to vector<1x128xi1>
    %17 = vector.broadcast %16 : vector<1x128xi1> to vector<8x128xi1>
    %18 = arith.select %17, %14, %15 : vector<8x128xi1>, vector<8x128xf32>
    %c0_2 = arith.constant 0 : index
    %c0_3 = arith.constant 0 : index
    %19 = vector.load %arg2[%c0_2, %c0_3] : memref<128x128xf32, #tpu.memory_space<vmem>>, vector<128x128xf32>
    %cst_4 = arith.constant dense<0.000000e+00> : vector<8x128xf32>
    %20 = tpu.matmul %18, %19, %cst_4 {dimension_numbers = #tpu.dot_dimension_numbers<[1], [0], [0], [1], [0, 0, 1, 1], [], []>} : vector<8x128xf32>, vector<128x128xf32>, vector<8x128xf32> -> vector<8x128xf32>
    %c0_5 = arith.constant 0 : index
    %c0_6 = arith.constant 0 : index
    %21 = vector.load %arg3[%c0_5, %c0_6] : memref<1x128xf32, #tpu.memory_space<vmem>>, vector<1x128xf32>
    %22 = vector.broadcast %21 : vector<1x128xf32> to vector<8x128xf32>
    %23 = arith.addf %20, %22 : vector<8x128xf32>
    %24 = arith.negf %23 : vector<8x128xf32>
    %25 = math.exp %24 : vector<8x128xf32>
    %cst_7 = arith.constant 1.000000e+00 : f32
    %26 = vector.broadcast %cst_7 : f32 to vector<8x128xf32>
    %27 = arith.addf %26, %25 : vector<8x128xf32>
    %28 = arith.divf %26, %27 : vector<8x128xf32>
    %29 = arith.mulf %23, %28 : vector<8x128xf32>
    %c0_8 = arith.constant 0 : index
    %c0_9 = arith.constant 0 : index
    %30 = vector.load %arg4[%c0_8, %c0_9] : memref<128x128xf32, #tpu.memory_space<vmem>>, vector<128x128xf32>
    %cst_10 = arith.constant dense<0.000000e+00> : vector<8x128xf32>
    %31 = tpu.matmul %29, %30, %cst_10 {dimension_numbers = #tpu.dot_dimension_numbers<[1], [0], [0], [1], [0, 0, 1, 1], [], []>} : vector<8x128xf32>, vector<128x128xf32>, vector<8x128xf32> -> vector<8x128xf32>
    %c0_11 = arith.constant 0 : index
    %c0_12 = arith.constant 0 : index
    %32 = vector.load %arg5[%c0_11, %c0_12] : memref<1x128xf32, #tpu.memory_space<vmem>>, vector<1x128xf32>
    %33 = vector.broadcast %32 : vector<1x128xf32> to vector<8x128xf32>
    %34 = arith.addf %31, %33 : vector<8x128xf32>
    %c0_13 = arith.constant 0 : index
    %c0_14 = arith.constant 0 : index
    %35 = vector.load %arg6[%c0_13, %c0_14] : memref<8x128xf32, #tpu.memory_space<vmem>>, vector<8x128xf32>
    tpu.vector_store %arg6[%c0_13, %c0_14], %34 {strides = array<i32>} : memref<8x128xf32, #tpu.memory_space<vmem>>, vector<8x128xf32>,
    return
  }
  func.func @transform_0(%arg0: i32) -> (i32, i32) {
    %c0_i32 = arith.constant 0 : i32
    %c0_i32_0 = arith.constant 0 : i32
    return %arg0, %c0_i32 : i32, i32
  }
  func.func @transform_1(%arg0: i32) -> (i32, i32) {
    %c0_i32 = arith.constant 0 : i32
    %c0_i32_0 = arith.constant 0 : i32
    %c0_i32_1 = arith.constant 0 : i32
    return %c0_i32, %c0_i32_0 : i32, i32
  }
  func.func @transform_2(%arg0: i32) -> (i32, i32) {
    %c0_i32 = arith.constant 0 : i32
    %c0_i32_0 = arith.constant 0 : i32
    %c0_i32_1 = arith.constant 0 : i32
    return %c0_i32, %c0_i32_0 : i32, i32
  }
  func.func @transform_3(%arg0: i32) -> (i32, i32) {
    %c0_i32 = arith.constant 0 : i32
    %c0_i32_0 = arith.constant 0 : i32
    %c0_i32_1 = arith.constant 0 : i32
    return %c0_i32, %c0_i32_0 : i32, i32
  }
  func.func @transform_4(%arg0: i32) -> (i32, i32) {
    %c0_i32 = arith.constant 0 : i32
    %c0_i32_0 = arith.constant 0 : i32
    %c0_i32_1 = arith.constant 0 : i32
    return %c0_i32, %c0_i32_0 : i32, i32
  }
  func.func @transform_5(%arg0: i32) -> (i32, i32) {
    %c0_i32 = arith.constant 0 : i32
    %c0_i32_0 = arith.constant 0 : i32
    return %arg0, %c0_i32 : i32, i32
  }
}

</mosaic_0001>

<bundles_post_ra>
// kernel: forward.1
= control target key start
LH: loop header
LB: loop body
LE: loop exit
PB: predicated region body
PF: predicated region fallthrough
CT: control target
= control target key end

     0   :  { %10 = vsyncpa [#allocation3], 0  ;;  %s841_s0 = inlined_call_operand.vmem [shape: f32[8,1], index: 0, kind: input, shape index: {}]   ;;  %s842_s1 = inlined_call_operand.hbm [shape: f32[128,128], index: 1, kind: input, shape index: {}]   ;;  %s843_s2 = inlined_call_operand.vmem [shape: f32[1,128], index: 2, kind: input, shape index: {}]   ;;  %s844_s3 = inlined_call_operand.hbm [shape: f32[128,128], index: 3, kind: input, shape index: {}]   ;;  %s845_s4 = inlined_call_operand.vmem [shape: f32[1,128], index: 4, kind: input, shape index: {}]   ;;  %s846_s5 = inlined_call_operand.vmem [shape: f32[8,128], index: 5, kind: output, shape index: {}]  }
   0x1   :  { %11 = vsyncpa [#allocation5], 0  ;;  %s715_s18 = smov [#allocation2]   ;;  %s667_s22 = scalar_lea.hbm %s842_s1, 2048 }
   0x2   :  { %s19_s19 = sshll.u32 %s715_s18, 4  ;;  %p668_p0 = scmp.ne.s32.totalorder %s842_s1, %s667_s22  ;;  %s20_s19 = int_to_ptr.vmem [resolvable:$true] %s19_s19 }
   0x3   :  { %p671_p1 = scmp.lt.u32.totalorder %s667_s22, %s842_s1 }
   0x5   :  { %p673_p2 = pnand %p671_p1, %p668_p0 }
   0x7   :  { %676 = shalt.err (!%p673_p2)
}
   0x8   :  { %s677_s27 = scalar_lea.vmem %s20_s19, 2048  ;;  %p682_p4 = scmp.lt.s32.totalorder %s20_s19, %s20_s19 }
   0x9   :  { %p678_p3 = scmp.ne.s32.totalorder %s20_s19, %s677_s27  ;;  %p683_p5 = scmp.lt.s32.totalorder %s677_s27, %s677_s27 }
   0xb   :  { %p684_p6 = por %p683_p5, %p682_p4 }
   0xd   :  { %p685_p7 = pnand %p684_p6, %p678_p3 }
   0xf   :  { %688 = shalt.err (!%p685_p7)
}
  0x10   :  { %s716_s28 = smov 128   ;;  %s717_s29 = smov 8  }
  0x11   :  { %25 = dma.hbm_to_vmem [thread:$0]  %s842_s1, 2048, %s20_s19, [#allocation3], %s716_s28, %s716_s28, %s717_s29  }
  0x12   :  { %s718_s7 = smov [#allocation4]   ;;  %s689_s11 = scalar_lea.hbm %s844_s3, 2048 }
  0x13   :  { %s33_s8 = sshll.u32 %s718_s7, 4  ;;  %p690_p8 = scmp.ne.s32.totalorder %s844_s3, %s689_s11  ;;  %s34_s8 = int_to_ptr.vmem [resolvable:$true] %s33_s8 }
  0x14   :  { %p693_p9 = scmp.lt.u32.totalorder %s689_s11, %s844_s3 }
  0x16   :  { %p695_p10 = pnand %p693_p9, %p690_p8 }
  0x18   :  { %698 = shalt.err (!%p695_p10)
}
  0x19   :  { %s699_s16 = scalar_lea.vmem %s34_s8, 2048  ;;  %p704_p12 = scmp.lt.s32.totalorder %s34_s8, %s34_s8 }
  0x1a   :  { %p700_p11 = scmp.ne.s32.totalorder %s34_s8, %s699_s16  ;;  %p705_p13 = scmp.lt.s32.totalorder %s699_s16, %s699_s16 }
  0x1c   :  { %p706_p0 = por %p705_p13, %p704_p12 }
  0x1e   :  { %p707_p1 = pnand %p706_p0, %p700_p11 }
  0x20   :  { %710 = shalt.err (!%p707_p1)
}
  0x21   :  { %39 = dma.hbm_to_vmem [thread:$0]  %s844_s3, 2048, %s34_s8, [#allocation5], %s716_s28, %s716_s28, %s717_s29  }
  0x22   :  { %711 = dma.done.wait [#allocation3], 2048  }
  0x23   :  { %712 = vsyncadd [#allocation3], 4294965248 }
  0x24   :  { %713 = dma.done.wait [#allocation5], 2048  }
  0x25   :  { %714 = vsyncadd [#allocation5], 4294965248  ;;  %v719_v0 = vmov 0   ;;  %v57_v1 = vld [vmem:[%s841_s0] sm:$0xff]  ;;  %v275_v3 = vld [vmem:[#allocation2 + $0x8] sm:$0xff]  ;;  %v720_v5 = vmov 0.0|0.0   ;;  %v48_v28 = vlaneseq }
  0x26   :  { %656 = vset.pattern.permute.xlu0 %v719_v0  ;;  %v274_v2 = vld [vmem:[#allocation2] sm:$0xff]  ;;  %590 = vmatprep.subr.bf16.mxu0 %v720_v5  ;;  %v276_v6 = vld [vmem:[#allocation2 + $0x10] sm:$0xff]  ;;  %v277_v7 = vld [vmem:[#allocation2 + $0x18] sm:$0xff]  ;;  %vm721_vm0 = vmmov 0   ;;  %v722_v20 = vmov 0.0  }
  0x27   :  { %60 = vperm.xlu0 %656, %v57_v1   ;;  %v591_v4 = vpack.c.bf16 %v275_v3, %v274_v2  ;;  %614 = vmatprep.subr.bf16.mxu1 %v720_v5  ;;  %v594_v8 = vpack.c.bf16 %v277_v7, %v276_v6  ;;  %v278_v9 = vld [vmem:[#allocation2 + $0x20] sm:$0xff]  ;;  %v279_v10 = vld [vmem:[#allocation2 + $0x28] sm:$0xff]  ;;  %v280_v12 = vld [vmem:[#allocation2 + $0x30] sm:$0xff]  ;;  %v795_v29 = vand.u32 127, %v48_v28  ;;  %v723_v48 = vmov 683565275  }
  0x28   :  { %v597_v11 = vpack.c.bf16 %v279_v10, %v278_v9  ;;  %v281_v13 = vld [vmem:[#allocation2 + $0x38] sm:$0xff]  ;;  %v282_v15 = vld [vmem:[#allocation2 + $0x40] sm:$0xff]  ;;  %v283_v16 = vld [vmem:[#allocation2 + $0x48] sm:$0xff]  ;;  %552 = vmatprep.mubr.msk.f32.mxu0 %vm721_vm0, %v722_v20  ;;  %587 = vmatprep.mubr.msk.f32.mxu1 %vm721_vm0, %v722_v20  ;;  %v724_v50 = vmov 2475754826  }
  0x29   :  { %592 = vmatpush3.bf16.msra.mxu0 %v591_v4  ;;  %v600_v14 = vpack.c.bf16 %v281_v13, %v280_v12  ;;  %v284_v17 = vld [vmem:[#allocation2 + $0x50] sm:$0xff]  ;;  %v603_v18 = vpack.c.bf16 %v283_v16, %v282_v15  ;;  %v285_v19 = vld [vmem:[#allocation2 + $0x58] sm:$0xff]  ;;  %v286_v22 = vld [vmem:[#allocation2 + $0x60] sm:$0xff]  ;;  %v474_v30 = vadd.s32 4294967292, %v795_v29  ;;  %vm50_vm1 = vcmp.lt.s32.totalorder %v795_v29, 4 }
  0x2a   :  { %593 = vmatprep.subr.bf16.mxu0 %v720_v5  ;;  %v606_v21 = vpack.c.bf16 %v285_v19, %v284_v17  ;;  %v287_v23 = vld [vmem:[#allocation2 + $0x68] sm:$0xff]  ;;  %v288_v25 = vld [vmem:[#allocation2 + $0x70] sm:$0xff]  ;;  %v289_v26 = vld [vmem:[#allocation2 + $0x78] sm:$0xff]  ;;  %v725_v53 = vmov 2131351028  }
  0x2b   :  { %v609_v24 = vpack.c.bf16 %v287_v23, %v286_v22  ;;  %v612_v27 = vpack.c.bf16 %v289_v26, %v288_v25  ;;  %v52_v31 = vsel %vm50_vm1, %v795_v29, %v474_v30  ;;  %v726_v56 = vmov 2102212464   ;;  %v380_v29 = vld [vmem:[#allocation4 + $0x30] sm:$0xff] }
  0x2c   :  { %v53_v32 = vcvt.s32.f32 %v52_v31  ;;  %v727_v59 = vmov 920167782   ;;  %v728_v62 = vmov 1326507024  }
  0x2d   :  { %595 = vmatpush3.bf16.msra.mxu0 %v594_v8 }
  0x2e   :  { %596 = vmatprep.subr.bf16.mxu0 %v720_v5  ;;  %v54_v33 = vmul.f32 -3.0701134, %v53_v32 }
  0x30   :  { %v55_v34 = vmul.f32 1.442695, %v54_v33 }
  0x31   :  { %598 = vmatpush3.bf16.msra.mxu0 %v597_v11 }
  0x32   :  { %599 = vmatprep.subr.bf16.mxu0 %v720_v5  ;;  %657 = vpow2.f32 %v55_v34 }
  0x35   :  { %601 = vmatpush3.bf16.msra.mxu0 %v600_v14 }
  0x36   :  { %602 = vmatprep.subr.bf16.mxu0 %v720_v5 }
  0x39   :  { %604 = vmatpush3.bf16.msra.mxu0 %v603_v18 }
  0x3a   :  { %605 = vmatprep.subr.bf16.mxu0 %v720_v5 }
  0x3c   :  { %v658_v35 = vpop.eup %657 }
  0x3d   :  { %607 = vmatpush3.bf16.msra.mxu0 %v606_v21 }
  0x3e   :  { %608 = vmatprep.subr.bf16.mxu0 %v720_v5 }
  0x41   :  { %610 = vmatpush3.bf16.msra.mxu0 %v609_v24 }
  0x42   :  { %611 = vmatprep.subr.bf16.mxu0 %v720_v5 }
  0x45   :  { %613 = vmatpush3.bf16.msra.mxu0 %v612_v27 }
  0xa6   :  { %v61_v36 = vpop.permute.xlu0 %60 }
  0xa7   :  { %v802_v37 = vmul.f32 %v658_v35, %v61_v36 }
  0xa9   :  { %v67_v38 = vand.u32 2139095040, %v802_v37  ;;  %v64_v42 = vand.u32 2147483647, %v802_v37  ;;  %vm66_vm9 = vcmp.lt.s32.totalorder %v802_v37, 0 }
  0xab   :  { %v68_v39 = vshrl.u32 %v67_v38, 23  ;;  %v71_v45 = vand.u32 8388607, %v64_v42  ;;  %vm65_vm10 = vcmp.le.f32.partialorder %v64_v42, 0.7853982 }
  0xad   :  { %v475_v40 = vadd.s32 4294967169, %v68_v39  ;;  %v72_v0 = vor.u32 8388608, %v71_v45 }
  0xaf   :  { %v74_v41 = vadd.s32 1, %v475_v40  ;;  %v112_v15 = vshll.u32 %v72_v0, 8 }
  0xb1   :  { %vm75_vm2 = vcmp.gt.s32.totalorder %v74_v41, 0 }
  0xb2   :  { %v76_v43 = vsel %vm75_vm2, %v74_v41, 0  ;;  %vm156_vm2 = vweird.f32 %v802_v37 }
  0xb3   :  { %v78_v44 = vand.u32 31, %v76_v43  ;;  %v77_v47 = vshrl.u32 %v76_v43, 5 }
  0xb5   :  { %v79_v46 = vsub.s32 32, %v78_v44  ;;  %v81_v49 = vshll.u32 %v723_v48, %v78_v44  ;;  %v84_v51 = vshll.u32 %v724_v50, %v78_v44  ;;  %v87_v55 = vshll.u32 %v725_v53, %v78_v44 }
  0xb6   :  { %v90_v58 = vshll.u32 %v726_v56, %v78_v44  ;;  %v93_v61 = vshll.u32 %v727_v59, %v78_v44  ;;  %vm96_vm3 = vcmp.lt.s32.totalorder %v77_v47, 1  ;;  %vm99_vm4 = vcmp.lt.s32.totalorder %v77_v47, 4 }
  0xb7   :  { %v82_v52 = vshrl.u32 %v724_v50, %v79_v46  ;;  %v85_v54 = vshrl.u32 %v725_v53, %v79_v46  ;;  %v88_v57 = vshrl.u32 %v726_v56, %v79_v46  ;;  %v91_v60 = vshrl.u32 %v727_v59, %v79_v46 }
  0xb8   :  { %v94_v63 = vshrl.u32 %v728_v62, %v79_v46  ;;  %v80_v10 = vshrl.u32 %v723_v48, %v79_v46  ;;  %vm98_vm5 = vcmp.lt.s32.totalorder %v77_v47, 3  ;;  %vm97_vm6 = vcmp.lt.s32.totalorder %v77_v47, 2 }
  0xb9   :  { %v83_v1 = vor.u32 %v82_v52, %v81_v49  ;;  %v86_v2 = vor.u32 %v85_v54, %v84_v51  ;;  %v89_v3 = vor.u32 %v88_v57, %v87_v55  ;;  %v92_v4 = vor.u32 %v91_v60, %v90_v58 }
  0xba   :  { %v95_v6 = vor.u32 %v94_v63, %v93_v61 }
  0xbb   :  { %v101_v7 = vsel %vm99_vm4, %v89_v3, 2102212464  ;;  %v104_v8 = vsel %vm96_vm3, %v83_v1, %v86_v2  ;;  %v108_v9 = vsel %vm96_vm3, %v86_v2, %v89_v3  ;;  %v105_v11 = vsel %vm99_vm4, %v92_v4, 920167782 }
  0xbc   :  { %v109_v12 = vsel %vm99_vm4, %v95_v6, 1326507024  ;;  %v106_v13 = vsel %vm98_vm5, %v89_v3, %v105_v11  ;;  %v100_v16 = vsel %vm96_vm3, %v80_v10, %v83_v1  ;;  %v102_v17 = vsel %vm98_vm5, %v86_v2, %v101_v7  ;;  %v374_v11 = vld [vmem:[#allocation4] sm:$0xff] }
  0xbd   :  { %v110_v14 = vsel %vm98_vm5, %v92_v4, %v109_v12  ;;  %v107_v18 = vsel %vm97_vm6, %v104_v8, %v106_v13  ;;  %v103_v24 = vsel %vm97_vm6, %v100_v16, %v102_v17  ;;  %v375_v12 = vld [vmem:[#allocation4 + $0x8] sm:$0xff] }
  0xbe   :  { %v111_v19 = vsel %vm97_vm6, %v108_v9, %v110_v14  ;;  %v811_v22 = vmul.u32.u64.low %v112_v15, %v107_v18  ;;  %v812_v23 = vmul.u32.u64.high %v112_v15, %v107_v18, %v811_v22  ;;  %v119_v26 = vmul.u32 %v112_v15, %v103_v24  ;;  %v376_v14 = vld [vmem:[#allocation4 + $0x10] sm:$0xff]  ;;  %v379_v17 = vld [vmem:[#allocation4 + $0x28] sm:$0xff] }
  0xbf   :  { %v808_v20 = vmul.u32.u64.low %v112_v15, %v111_v19  ;;  %v809_v21 = vmul.u32.u64.high %v112_v15, %v111_v19, %v808_v20  ;;  %v615_v13 = vpack.c.bf16 %v375_v12, %v374_v11  ;;  %v377_v15 = vld [vmem:[#allocation4 + $0x18] sm:$0xff]  ;;  %v384_v24 = vld [vmem:[#allocation4 + $0x50] sm:$0xff] }
  0xc0   :  { %v122_v25 = vadd.s32 1, %v812_v23  ;;  %v618_v16 = vpack.c.bf16 %v377_v15, %v376_v14  ;;  %v381_v19 = vld [vmem:[#allocation4 + $0x38] sm:$0xff] }
  0xc1   :  { %vm121_vm7 = vc.u32 %v809_v21, %v811_v22  ;;  %v120_v40 = vadd.s32 %v811_v22, %v809_v21  ;;  %616 = vmatpush3.bf16.msra.mxu1 %v615_v13  ;;  %v624_v20 = vpack.c.bf16 %v381_v19, %v380_v29  ;;  %v382_v21 = vld [vmem:[#allocation4 + $0x40] sm:$0xff]  ;;  %v383_v22 = vld [vmem:[#allocation4 + $0x48] sm:$0xff] }
  0xc2   :  { %v123_v27 = vsel %vm121_vm7, %v122_v25, %v812_v23  ;;  %617 = vmatprep.subr.bf16.mxu1 %v720_v5  ;;  %v627_v23 = vpack.c.bf16 %v383_v22, %v382_v21  ;;  %v385_v25 = vld [vmem:[#allocation4 + $0x58] sm:$0xff] }
  0xc3   :  { %v124_v28 = vadd.s32 %v123_v27, %v119_v26  ;;  %v630_v26 = vpack.c.bf16 %v385_v25, %v384_v24  ;;  %v386_v27 = vld [vmem:[#allocation4 + $0x60] sm:$0xff] }
  0xc5   :  { %v125_v30 = vadd.s32 536870912, %v124_v28  ;;  %619 = vmatpush3.bf16.msra.mxu1 %v618_v16 }
  0xc6   :  { %620 = vmatprep.subr.bf16.mxu1 %v720_v5 }
  0xc7   :  { %v126_v31 = vshrl.u32 %v125_v30, 30 }
  0xc9   :  { %v127_v32 = vshll.u32 %v126_v31, 30  ;;  %v150_v53 = vsub.s32 4, %v126_v31 }
  0xcb   :  { %v128_v33 = vsub.s32 %v124_v28, %v127_v32  ;;  %v151_v56 = vsel %vm66_vm9, %v150_v53, %v126_v31  ;;  %v387_v28 = vld [vmem:[#allocation4 + $0x68] sm:$0xff]  ;;  %v388_v31 = vld [vmem:[#allocation4 + $0x70] sm:$0xff]  ;;  %v389_v32 = vld [vmem:[#allocation4 + $0x78] sm:$0xff] }
  0xcc   :  { %v153_v58 = vsel %vm65_vm10, 0, %v151_v56  ;;  %v633_v30 = vpack.c.bf16 %v387_v28, %v386_v27 }
  0xcd   :  { %v130_v34 = vsub.s32 0, %v128_v33  ;;  %v157_v59 = vadd.s32 3, %v153_v58  ;;  %v261_v61 = vand.u32 3, %v153_v58 }
  0xcf   :  { %v476_v35 = vmin.u32 %v130_v34, %v128_v33  ;;  %v158_v60 = vand.u32 3, %v157_v59  ;;  %vm266_vm12 = vcmp.eq.s32.totalorder %v261_v61, 2  ;;  %vm263_vm14 = vcmp.eq.s32.totalorder %v261_v61, 0  ;;  %v483_v34 = vld [vmem:[%s843_s2] ss:$0 sm:$0xff] }
  0xd0   :  { %vm262_vm0 = vcmp.lt.s32.totalorder %v261_v61, 2 }
  0xd1   :  { %v132_v36 = vclz %v476_v35  ;;  %vm163_vm11 = vcmp.eq.s32.totalorder %v158_v60, 2  ;;  %vm160_vm13 = vcmp.eq.s32.totalorder %v158_v60, 0  ;;  %vm159_vm15 = vcmp.lt.s32.totalorder %v158_v60, 2 }
  0xd3   :  { %v477_v38 = vadd.s32 4294967294, %v132_v36 }
  0xd5   :  { %vm478_vm8 = vcmp.lt.s32.totalorder %v477_v38, 0 }
  0xd6   :  { %v135_v39 = vsel %vm478_vm8, 0, %v477_v38 }
  0xd7   :  { %v136_v41 = vsub.s32 32, %v135_v39  ;;  %v140_v43 = vsub.s32 4294967266, %v135_v39  ;;  %v137_v44 = vshll.u32 %v128_v33, %v135_v39  ;;  %v636_v33 = vpack.c.bf16 %v389_v32, %v388_v31 }
  0xd9   :  { %v138_v45 = vshrl.u32 %v120_v40, %v136_v41  ;;  %v141_v46 = vadd.s32 127, %v140_v43 }
  0xdb   :  { %v139_v47 = vor.u32 %v138_v45, %v137_v44  ;;  %v142_v48 = vshll.u32 %v141_v46, 23 }
  0xdd   :  { %v143_v49 = vor.u32 4788187, %v142_v48  ;;  %v146_v51 = vcvt.s32.f32 %v139_v47 }
  0xdf   :  { %v144_v50 = vand.u32 2147483647, %v143_v49 }
  0xe1   :  { %v147_v52 = vmul.f32 %v146_v51, %v144_v50 }
  0xe3   :  { %v148_v54 = vxor.u32 2147483648, %v147_v52 }
  0xe5   :  { %v149_v55 = vsel %vm66_vm9, %v148_v54, %v147_v52 }
  0xe6   :  { %v152_v57 = vsel %vm65_vm10, %v802_v37, %v149_v55  ;;  %v378_v37 = vld [vmem:[#allocation4 + $0x20] sm:$0xff] }
  0xe7   :  { %659 = vcosq.f32 %v152_v57  ;;  %v621_v18 = vpack.c.bf16 %v379_v17, %v378_v37 }
  0xe8   :  { %661 = vsinq.f32 %v152_v57 }
  0xe9   :  { %622 = vmatpush3.bf16.msra.mxu1 %v621_v18 }
  0xea   :  { %623 = vmatprep.subr.bf16.mxu1 %v720_v5 }
  0xed   :  { %625 = vmatpush3.bf16.msra.mxu1 %v624_v20 }
  0xee   :  { %626 = vmatprep.subr.bf16.mxu1 %v720_v5 }
  0xf1   :  { %v660_v62 = vpop.eup %659  ;;  %628 = vmatpush3.bf16.msra.mxu1 %v627_v23 }
  0xf2   :  { %v662_v63 = vpop.eup %661  ;;  %v164_v0 = vxor.u32 2147483648, %v660_v62  ;;  %629 = vmatprep.subr.bf16.mxu1 %v720_v5 }
  0xf3   :  { %v161_v1 = vxor.u32 2147483648, %v662_v63 }
  0xf4   :  { %v165_v2 = vsel %vm163_vm11, %v164_v0, %v662_v63  ;;  %v268_v42 = vsel %vm266_vm12, %v164_v0, %v662_v63 }
  0xf5   :  { %v162_v3 = vsel %vm160_vm13, %v660_v62, %v161_v1  ;;  %v265_v4 = vsel %vm263_vm14, %v660_v62, %v161_v1  ;;  %631 = vmatpush3.bf16.msra.mxu1 %v630_v26 }
  0xf6   :  { %v166_v6 = vsel %vm159_vm15, %v162_v3, %v165_v2  ;;  %v269_v7 = vsel %vm262_vm0, %v265_v4, %v268_v42  ;;  %632 = vmatprep.subr.bf16.mxu1 %v720_v5 }
  0xf7   :  { %v167_v8 = vsel %vm156_vm2, nan, %v166_v6  ;;  %v270_v9 = vsel %vm156_vm2, nan, %v269_v7 }
  0xf8   :  { %v273_v10 = vsel %vm50_vm1, %v167_v8, %v270_v9 }
  0xf9   :  { %553 = vmatmul.mubr.f32.vlgmr.msra.gmra.mrb[0].mxu0 %v273_v10  ;;  %634 = vmatpush3.bf16.msra.mxu1 %v633_v30 }
  0xfa   :  { %635 = vmatprep.subr.bf16.mxu1 %v720_v5  ;;  %v485_v5 = vld [vmem:[%s845_s4] ss:$0 sm:$0xff] }
  0xfd   :  { %637 = vmatpush3.bf16.msra.mxu1 %v636_v33 }
 0x1cc   :  { %v363_v35 = vpop.f32.mrb[0].mxu0 }
 0x1cd   :  { %v364_v36 = vadd.f32 %v483_v34, %v363_v35  ;;  %v554_v38 = vpop.f32.mrb[1].mxu0 }
 0x1cf   :  { %v484_v39 = vmul.f32 -1.442695, %v364_v36 }
 0x1d1   :  { %663 = vpow2.f32 %v484_v39 }
 0x1db   :  { %v664_v40 = vpop.eup %663 }
 0x1dc   :  { %v370_v41 = vadd.f32 1.0, %v664_v40 }
 0x1de   :  { %665 = vrcp.f32 %v370_v41 }
 0x1e8   :  { %v666_v43 = vpop.eup %665 }
 0x1e9   :  { %v373_v44 = vmul.f32 %v666_v43, %v364_v36 }
 0x1eb   :  { %588 = vmatmul.mubr.f32.vlgmr.msra.gmra.mrb[0].mxu1 %v373_v44 }
 0x2be   :  { %v463_v45 = vpop.f32.mrb[0].mxu1 }
 0x2bf   :  { %v464_v46 = vadd.f32 %v485_v5, %v463_v45  ;;  %v589_v47 = vpop.f32.mrb[1].mxu1 }
 0x2c1   :  { %467 = vst [vmem:[%s846_s5] sm:$0xff] %v464_v46 }
 0x2c2   :  { %472 = vsyncpa [#allocation3], 1 }
 0x2c3   :  { %473 = vsyncpa [#allocation5], 1 }

// kernel: forward.1
= control target key start
LH: loop header
LB: loop body
LE: loop exit
PB: predicated region body
PF: predicated region fallthrough
CT: control target
= control target key end

     0   :  { %10 = vsyncpa [#allocation3], 0  ;;  %s841_s0 = inlined_call_operand.vmem [shape: f32[8,1], index: 0, kind: input, shape index: {}]   ;;  %s842_s1 = inlined_call_operand.hbm [shape: f32[128,128], index: 1, kind: input, shape index: {}]   ;;  %s843_s2 = inlined_call_operand.vmem [shape: f32[1,128], index: 2, kind: input, shape index: {}]   ;;  %s844_s3 = inlined_call_operand.hbm [shape: f32[128,128], index: 3, kind: input, shape index: {}]   ;;  %s845_s4 = inlined_call_operand.vmem [shape: f32[1,128], index: 4, kind: input, shape index: {}]   ;;  %s846_s5 = inlined_call_operand.vmem [shape: f32[8,128], index: 5, kind: output, shape index: {}]  }
   0x1   :  { %11 = vsyncpa [#allocation5], 0  ;;  %s715_s18 = smov [#allocation2]   ;;  %s667_s22 = scalar_lea.hbm %s842_s1, 2048 }
   0x2   :  { %s19_s19 = sshll.u32 %s715_s18, 4  ;;  %p668_p0 = scmp.ne.s32.totalorder %s842_s1, %s667_s22  ;;  %s20_s19 = int_to_ptr.vmem [resolvable:$true] %s19_s19 }
   0x3   :  { %p671_p1 = scmp.lt.u32.totalorder %s667_s22, %s842_s1 }
   0x5   :  { %p673_p2 = pnand %p671_p1, %p668_p0 }
   0x7   :  { %676 = shalt.err (!%p673_p2)
}
   0x8   :  { %s677_s27 = scalar_lea.vmem %s20_s19, 2048  ;;  %p682_p4 = scmp.lt.s32.totalorder %s20_s19, %s20_s19 }
   0x9   :  { %p678_p3 = scmp.ne.s32.totalorder %s20_s19, %s677_s27  ;;  %p683_p5 = scmp.lt.s32.totalorder %s677_s27, %s677_s27 }
   0xb   :  { %p684_p6 = por %p683_p5, %p682_p4 }
   0xd   :  { %p685_p7 = pnand %p684_p6, %p678_p3 }
   0xf   :  { %688 = shalt.err (!%p685_p7)
}
  0x10   :  { %s716_s28 = smov 128   ;;  %s717_s29 = smov 8  }
  0x11   :  { %25 = dma.hbm_to_vmem [thread:$0]  %s842_s1, 2048, %s20_s19, [#allocation3], %s716_s28, %s716_s28, %s717_s29  }
  0x12   :  { %s718_s7 = smov [#allocation4]   ;;  %s689_s11 = scalar_lea.hbm %s844_s3, 2048 }
  0x13   :  { %s33_s8 = sshll.u32 %s718_s7, 4  ;;  %p690_p8 = scmp.ne.s32.totalorder %s844_s3, %s689_s11  ;;  %s34_s8 = int_to_ptr.vmem [resolvable:$true] %s33_s8 }
  0x14   :  { %p693_p9 = scmp.lt.u32.totalorder %s689_s11, %s844_s3 }
  0x16   :  { %p695_p10 = pnand %p693_p9, %p690_p8 }
  0x18   :  { %698 = shalt.err (!%p695_p10)
}
  0x19   :  { %s699_s16 = scalar_lea.vmem %s34_s8, 2048  ;;  %p704_p12 = scmp.lt.s32.totalorder %s34_s8, %s34_s8 }
  0x1a   :  { %p700_p11 = scmp.ne.s32.totalorder %s34_s8, %s699_s16  ;;  %p705_p13 = scmp.lt.s32.totalorder %s699_s16, %s699_s16 }
  0x1c   :  { %p706_p0 = por %p705_p13, %p704_p12 }
  0x1e   :  { %p707_p1 = pnand %p706_p0, %p700_p11 }
  0x20   :  { %710 = shalt.err (!%p707_p1)
}
  0x21   :  { %39 = dma.hbm_to_vmem [thread:$0]  %s844_s3, 2048, %s34_s8, [#allocation5], %s716_s28, %s716_s28, %s717_s29  }
  0x22   :  { %711 = dma.done.wait [#allocation3], 2048  }
  0x23   :  { %712 = vsyncadd [#allocation3], 4294965248 }
  0x24   :  { %713 = dma.done.wait [#allocation5], 2048  }
  0x25   :  { %714 = vsyncadd [#allocation5], 4294965248  ;;  %v719_v0 = vmov 0   ;;  %v57_v1 = vld [vmem:[%s841_s0] sm:$0xff]  ;;  %v275_v3 = vld [vmem:[#allocation2 + $0x8] sm:$0xff]  ;;  %v720_v5 = vmov 0.0|0.0   ;;  %v48_v28 = vlaneseq }
  0x26   :  { %656 = vset.pattern.permute.xlu0 %v719_v0  ;;  %v274_v2 = vld [vmem:[#allocation2] sm:$0xff]  ;;  %590 = vmatprep.subr.bf16.mxu0 %v720_v5  ;;  %v276_v6 = vld [vmem:[#allocation2 + $0x10] sm:$0xff]  ;;  %v277_v7 = vld [vmem:[#allocation2 + $0x18] sm:$0xff]  ;;  %vm721_vm0 = vmmov 0   ;;  %v722_v20 = vmov 0.0  }
  0x27   :  { %60 = vperm.xlu0 %656, %v57_v1   ;;  %v591_v4 = vpack.c.bf16 %v275_v3, %v274_v2  ;;  %614 = vmatprep.subr.bf16.mxu1 %v720_v5  ;;  %v594_v8 = vpack.c.bf16 %v277_v7, %v276_v6  ;;  %v278_v9 = vld [vmem:[#allocation2 + $0x20] sm:$0xff]  ;;  %v279_v10 = vld [vmem:[#allocation2 + $0x28] sm:$0xff]  ;;  %v280_v12 = vld [vmem:[#allocation2 + $0x30] sm:$0xff]  ;;  %v795_v29 = vand.u32 127, %v48_v28  ;;  %v723_v48 = vmov 683565275  }
  0x28   :  { %v597_v11 = vpack.c.bf16 %v279_v10, %v278_v9  ;;  %v281_v13 = vld [vmem:[#allocation2 + $0x38] sm:$0xff]  ;;  %v282_v15 = vld [vmem:[#allocation2 + $0x40] sm:$0xff]  ;;  %v283_v16 = vld [vmem:[#allocation2 + $0x48] sm:$0xff]  ;;  %552 = vmatprep.mubr.msk.f32.mxu0 %vm721_vm0, %v722_v20  ;;  %587 = vmatprep.mubr.msk.f32.mxu1 %vm721_vm0, %v722_v20  ;;  %v724_v50 = vmov 2475754826  }
  0x29   :  { %592 = vmatpush3.bf16.msra.mxu0 %v591_v4  ;;  %v600_v14 = vpack.c.bf16 %v281_v13, %v280_v12  ;;  %v284_v17 = vld [vmem:[#allocation2 + $0x50] sm:$0xff]  ;;  %v603_v18 = vpack.c.bf16 %v283_v16, %v282_v15  ;;  %v285_v19 = vld [vmem:[#allocation2 + $0x58] sm:$0xff]  ;;  %v286_v22 = vld [vmem:[#allocation2 + $0x60] sm:$0xff]  ;;  %v474_v30 = vadd.s32 4294967292, %v795_v29  ;;  %vm50_vm1 = vcmp.lt.s32.totalorder %v795_v29, 4 }
  0x2a   :  { %593 = vmatprep.subr.bf16.mxu0 %v720_v5  ;;  %v606_v21 = vpack.c.bf16 %v285_v19, %v284_v17  ;;  %v287_v23 = vld [vmem:[#allocation2 + $0x68] sm:$0xff]  ;;  %v288_v25 = vld [vmem:[#allocation2 + $0x70] sm:$0xff]  ;;  %v289_v26 = vld [vmem:[#allocation2 + $0x78] sm:$0xff]  ;;  %v725_v53 = vmov 2131351028  }
  0x2b   :  { %v609_v24 = vpack.c.bf16 %v287_v23, %v286_v22  ;;  %v612_v27 = vpack.c.bf16 %v289_v26, %v288_v25  ;;  %v52_v31 = vsel %vm50_vm1, %v795_v29, %v474_v30  ;;  %v726_v56 = vmov 2102212464   ;;  %v380_v29 = vld [vmem:[#allocation4 + $0x30] sm:$0xff] }
  0x2c   :  { %v53_v32 = vcvt.s32.f32 %v52_v31  ;;  %v727_v59 = vmov 920167782   ;;  %v728_v62 = vmov 1326507024  }
  0x2d   :  { %595 = vmatpush3.bf16.msra.mxu0 %v594_v8 }
  0x2e   :  { %596 = vmatprep.subr.bf16.mxu0 %v720_v5  ;;  %v54_v33 = vmul.f32 -3.0701134, %v53_v32 }
  0x30   :  { %v55_v34 = vmul.f32 1.442695, %v54_v33 }
  0x31   :  { %598 = vmatpush3.bf16.msra.mxu0 %v597_v11 }
  0x32   :  { %599 = vmatprep.subr.bf16.mxu0 %v720_v5  ;;  %657 = vpow2.f32 %v55_v34 }
  0x35   :  { %601 = vmatpush3.bf16.msra.mxu0 %v600_v14 }
  0x36   :  { %602 = vmatprep.subr.bf16.mxu0 %v720_v5 }
  0x39   :  { %604 = vmatpush3.bf16.msra.mxu0 %v603_v18 }
  0x3a   :  { %605 = vmatprep.subr.bf16.mxu0 %v720_v5 }
  0x3c   :  { %v658_v35 = vpop.eup %657 }
  0x3d   :  { %607 = vmatpush3.bf16.msra.mxu0 %v606_v21 }
  0x3e   :  { %608 = vmatprep.subr.bf16.mxu0 %v720_v5 }
  0x41   :  { %610 = vmatpush3.bf16.msra.mxu0 %v609_v24 }
  0x42   :  { %611 = vmatprep.subr.bf16.mxu0 %v720_v5 }
  0x45   :  { %613 = vmatpush3.bf16.msra.mxu0 %v612_v27 }
  0xa6   :  { %v61_v36 = vpop.permute.xlu0 %60 }
  0xa7   :  { %v802_v37 = vmul.f32 %v658_v35, %v61_v36 }
  0xa9   :  { %v67_v38 = vand.u32 2139095040, %v802_v37  ;;  %v64_v42 = vand.u32 2147483647, %v802_v37  ;;  %vm66_vm9 = vcmp.lt.s32.totalorder %v802_v37, 0 }
  0xab   :  { %v68_v39 = vshrl.u32 %v67_v38, 23  ;;  %v71_v45 = vand.u32 8388607, %v64_v42  ;;  %vm65_vm10 = vcmp.le.f32.partialorder %v64_v42, 0.7853982 }
  0xad   :  { %v475_v40 = vadd.s32 4294967169, %v68_v39  ;;  %v72_v0 = vor.u32 8388608, %v71_v45 }
  0xaf   :  { %v74_v41 = vadd.s32 1, %v475_v40  ;;  %v112_v15 = vshll.u32 %v72_v0, 8 }
  0xb1   :  { %vm75_vm2 = vcmp.gt.s32.totalorder %v74_v41, 0 }
  0xb2   :  { %v76_v43 = vsel %vm75_vm2, %v74_v41, 0  ;;  %vm156_vm2 = vweird.f32 %v802_v37 }
  0xb3   :  { %v78_v44 = vand.u32 31, %v76_v43  ;;  %v77_v47 = vshrl.u32 %v76_v43, 5 }
  0xb5   :  { %v79_v46 = vsub.s32 32, %v78_v44  ;;  %v81_v49 = vshll.u32 %v723_v48, %v78_v44  ;;  %v84_v51 = vshll.u32 %v724_v50, %v78_v44  ;;  %v87_v55 = vshll.u32 %v725_v53, %v78_v44 }
  0xb6   :  { %v90_v58 = vshll.u32 %v726_v56, %v78_v44  ;;  %v93_v61 = vshll.u32 %v727_v59, %v78_v44  ;;  %vm96_vm3 = vcmp.lt.s32.totalorder %v77_v47, 1  ;;  %vm99_vm4 = vcmp.lt.s32.totalorder %v77_v47, 4 }
  0xb7   :  { %v82_v52 = vshrl.u32 %v724_v50, %v79_v46  ;;  %v85_v54 = vshrl.u32 %v725_v53, %v79_v46  ;;  %v88_v57 = vshrl.u32 %v726_v56, %v79_v46  ;;  %v91_v60 = vshrl.u32 %v727_v59, %v79_v46 }
  0xb8   :  { %v94_v63 = vshrl.u32 %v728_v62, %v79_v46  ;;  %v80_v10 = vshrl.u32 %v723_v48, %v79_v46  ;;  %vm98_vm5 = vcmp.lt.s32.totalorder %v77_v47, 3  ;;  %vm97_vm6 = vcmp.lt.s32.totalorder %v77_v47, 2 }
  0xb9   :  { %v83_v1 = vor.u32 %v82_v52, %v81_v49  ;;  %v86_v2 = vor.u32 %v85_v54, %v84_v51  ;;  %v89_v3 = vor.u32 %v88_v57, %v87_v55  ;;  %v92_v4 = vor.u32 %v91_v60, %v90_v58 }
  0xba   :  { %v95_v6 = vor.u32 %v94_v63, %v93_v61 }
  0xbb   :  { %v101_v7 = vsel %vm99_vm4, %v89_v3, 2102212464  ;;  %v104_v8 = vsel %vm96_vm3, %v83_v1, %v86_v2  ;;  %v108_v9 = vsel %vm96_vm3, %v86_v2, %v89_v3  ;;  %v105_v11 = vsel %vm99_vm4, %v92_v4, 920167782 }
  0xbc   :  { %v109_v12 = vsel %vm99_vm4, %v95_v6, 1326507024  ;;  %v106_v13 = vsel %vm98_vm5, %v89_v3, %v105_v11  ;;  %v100_v16 = vsel %vm96_vm3, %v80_v10, %v83_v1  ;;  %v102_v17 = vsel %vm98_vm5, %v86_v2, %v101_v7  ;;  %v374_v11 = vld [vmem:[#allocation4] sm:$0xff] }
  0xbd   :  { %v110_v14 = vsel %vm98_vm5, %v92_v4, %v109_v12  ;;  %v107_v18 = vsel %vm97_vm6, %v104_v8, %v106_v13  ;;  %v103_v24 = vsel %vm97_vm6, %v100_v16, %v102_v17  ;;  %v375_v12 = vld [vmem:[#allocation4 + $0x8] sm:$0xff] }
  0xbe   :  { %v111_v19 = vsel %vm97_vm6, %v108_v9, %v110_v14  ;;  %v811_v22 = vmul.u32.u64.low %v112_v15, %v107_v18  ;;  %v812_v23 = vmul.u32.u64.high %v112_v15, %v107_v18, %v811_v22  ;;  %v119_v26 = vmul.u32 %v112_v15, %v103_v24  ;;  %v376_v14 = vld [vmem:[#allocation4 + $0x10] sm:$0xff]  ;;  %v379_v17 = vld [vmem:[#allocation4 + $0x28] sm:$0xff] }
  0xbf   :  { %v808_v20 = vmul.u32.u64.low %v112_v15, %v111_v19  ;;  %v809_v21 = vmul.u32.u64.high %v112_v15, %v111_v19, %v808_v20  ;;  %v615_v13 = vpack.c.bf16 %v375_v12, %v374_v11  ;;  %v377_v15 = vld [vmem:[#allocation4 + $0x18] sm:$0xff]  ;;  %v384_v24 = vld [vmem:[#allocation4 + $0x50] sm:$0xff] }
  0xc0   :  { %v122_v25 = vadd.s32 1, %v812_v23  ;;  %v618_v16 = vpack.c.bf16 %v377_v15, %v376_v14  ;;  %v381_v19 = vld [vmem:[#allocation4 + $0x38] sm:$0xff] }
  0xc1   :  { %vm121_vm7 = vc.u32 %v809_v21, %v811_v22  ;;  %v120_v40 = vadd.s32 %v811_v22, %v809_v21  ;;  %616 = vmatpush3.bf16.msra.mxu1 %v615_v13  ;;  %v624_v20 = vpack.c.bf16 %v381_v19, %v380_v29  ;;  %v382_v21 = vld [vmem:[#allocation4 + $0x40] sm:$0xff]  ;;  %v383_v22 = vld [vmem:[#allocation4 + $0x48] sm:$0xff] }
  0xc2   :  { %v123_v27 = vsel %vm121_vm7, %v122_v25, %v812_v23  ;;  %617 = vmatprep.subr.bf16.mxu1 %v720_v5  ;;  %v627_v23 = vpack.c.bf16 %v383_v22, %v382_v21  ;;  %v385_v25 = vld [vmem:[#allocation4 + $0x58] sm:$0xff] }
  0xc3   :  { %v124_v28 = vadd.s32 %v123_v27, %v119_v26  ;;  %v630_v26 = vpack.c.bf16 %v385_v25, %v384_v24  ;;  %v386_v27 = vld [vmem:[#allocation4 + $0x60] sm:$0xff] }
  0xc5   :  { %v125_v30 = vadd.s32 536870912, %v124_v28  ;;  %619 = vmatpush3.bf16.msra.mxu1 %v618_v16 }
  0xc6   :  { %620 = vmatprep.subr.bf16.mxu1 %v720_v5 }
  0xc7   :  { %v126_v31 = vshrl.u32 %v125_v30, 30 }
  0xc9   :  { %v127_v32 = vshll.u32 %v126_v31, 30  ;;  %v150_v53 = vsub.s32 4, %v126_v31 }
  0xcb   :  { %v128_v33 = vsub.s32 %v124_v28, %v127_v32  ;;  %v151_v56 = vsel %vm66_vm9, %v150_v53, %v126_v31  ;;  %v387_v28 = vld [vmem:[#allocation4 + $0x68] sm:$0xff]  ;;  %v388_v31 = vld [vmem:[#allocation4 + $0x70] sm:$0xff]  ;;  %v389_v32 = vld [vmem:[#allocation4 + $0x78] sm:$0xff] }
  0xcc   :  { %v153_v58 = vsel %vm65_vm10, 0, %v151_v56  ;;  %v633_v30 = vpack.c.bf16 %v387_v28, %v386_v27 }
  0xcd   :  { %v130_v34 = vsub.s32 0, %v128_v33  ;;  %v157_v59 = vadd.s32 3, %v153_v58  ;;  %v261_v61 = vand.u32 3, %v153_v58 }
  0xcf   :  { %v476_v35 = vmin.u32 %v130_v34, %v128_v33  ;;  %v158_v60 = vand.u32 3, %v157_v59  ;;  %vm266_vm12 = vcmp.eq.s32.totalorder %v261_v61, 2  ;;  %vm263_vm14 = vcmp.eq.s32.totalorder %v261_v61, 0  ;;  %v483_v34 = vld [vmem:[%s843_s2] ss:$0 sm:$0xff] }
  0xd0   :  { %vm262_vm0 = vcmp.lt.s32.totalorder %v261_v61, 2 }
  0xd1   :  { %v132_v36 = vclz %v476_v35  ;;  %vm163_vm11 = vcmp.eq.s32.totalorder %v158_v60, 2  ;;  %vm160_vm13 = vcmp.eq.s32.totalorder %v158_v60, 0  ;;  %vm159_vm15 = vcmp.lt.s32.totalorder %v158_v60, 2 }
  0xd3   :  { %v477_v38 = vadd.s32 4294967294, %v132_v36 }
  0xd5   :  { %vm478_vm8 = vcmp.lt.s32.totalorder %v477_v38, 0 }
  0xd6   :  { %v135_v39 = vsel %vm478_vm8, 0, %v477_v38 }
  0xd7   :  { %v136_v41 = vsub.s32 32, %v135_v39  ;;  %v140_v43 = vsub.s32 4294967266, %v135_v39  ;;  %v137_v44 = vshll.u32 %v128_v33, %v135_v39  ;;  %v636_v33 = vpack.c.bf16 %v389_v32, %v388_v31 }
  0xd9   :  { %v138_v45 = vshrl.u32 %v120_v40, %v136_v41  ;;  %v141_v46 = vadd.s32 127, %v140_v43 }
  0xdb   :  { %v139_v47 = vor.u32 %v138_v45, %v137_v44  ;;  %v142_v48 = vshll.u32 %v141_v46, 23 }
  0xdd   :  { %v143_v49 = vor.u32 4788187, %v142_v48  ;;  %v146_v51 = vcvt.s32.f32 %v139_v47 }
  0xdf   :  { %v144_v50 = vand.u32 2147483647, %v143_v49 }
  0xe1   :  { %v147_v52 = vmul.f32 %v146_v51, %v144_v50 }
  0xe3   :  { %v148_v54 = vxor.u32 2147483648, %v147_v52 }
  0xe5   :  { %v149_v55 = vsel %vm66_vm9, %v148_v54, %v147_v52 }
  0xe6   :  { %v152_v57 = vsel %vm65_vm10, %v802_v37, %v149_v55  ;;  %v378_v37 = vld [vmem:[#allocation4 + $0x20] sm:$0xff] }
  0xe7   :  { %659 = vcosq.f32 %v152_v57  ;;  %v621_v18 = vpack.c.bf16 %v379_v17, %v378_v37 }
  0xe8   :  { %661 = vsinq.f32 %v152_v57 }
  0xe9   :  { %622 = vmatpush3.bf16.msra.mxu1 %v621_v18 }
  0xea   :  { %623 = vmatprep.subr.bf16.mxu1 %v720_v5 }
  0xed   :  { %625 = vmatpush3.bf16.msra.mxu1 %v624_v20 }
  0xee   :  { %626 = vmatprep.subr.bf16.mxu1 %v720_v5 }
  0xf1   :  { %v660_v62 = vpop.eup %659  ;;  %628 = vmatpush3.bf16.msra.mxu1 %v627_v23 }
  0xf2   :  { %v662_v63 = vpop.eup %661  ;;  %v164_v0 = vxor.u32 2147483648, %v660_v62  ;;  %629 = vmatprep.subr.bf16.mxu1 %v720_v5 }
  0xf3   :  { %v161_v1 = vxor.u32 2147483648, %v662_v63 }
  0xf4   :  { %v165_v2 = vsel %vm163_vm11, %v164_v0, %v662_v63  ;;  %v268_v42 = vsel %vm266_vm12, %v164_v0, %v662_v63 }
  0xf5   :  { %v162_v3 = vsel %vm160_vm13, %v660_v62, %v161_v1  ;;  %v265_v4 = vsel %vm263_vm14, %v660_v62, %v161_v1  ;;  %631 = vmatpush3.bf16.msra.mxu1 %v630_v26 }
  0xf6   :  { %v166_v6 = vsel %vm159_vm15, %v162_v3, %v165_v2  ;;  %v269_v7 = vsel %vm262_vm0, %v265_v4, %v268_v42  ;;  %632 = vmatprep.subr.bf16.mxu1 %v720_v5 }
  0xf7   :  { %v167_v8 = vsel %vm156_vm2, nan, %v166_v6  ;;  %v270_v9 = vsel %vm156_vm2, nan, %v269_v7 }
  0xf8   :  { %v273_v10 = vsel %vm50_vm1, %v167_v8, %v270_v9 }
  0xf9   :  { %553 = vmatmul.mubr.f32.vlgmr.msra.gmra.mrb[0].mxu0 %v273_v10  ;;  %634 = vmatpush3.bf16.msra.mxu1 %v633_v30 }
  0xfa   :  { %635 = vmatprep.subr.bf16.mxu1 %v720_v5  ;;  %v485_v5 = vld [vmem:[%s845_s4] ss:$0 sm:$0xff] }
  0xfd   :  { %637 = vmatpush3.bf16.msra.mxu1 %v636_v33 }
 0x1cc   :  { %v363_v35 = vpop.f32.mrb[0].mxu0 }
 0x1cd   :  { %v364_v36 = vadd.f32 %v483_v34, %v363_v35  ;;  %v554_v38 = vpop.f32.mrb[1].mxu0 }
 0x1cf   :  { %v484_v39 = vmul.f32 -1.442695, %v364_v36 }
 0x1d1   :  { %663 = vpow2.f32 %v484_v39 }
 0x1db   :  { %v664_v40 = vpop.eup %663 }
 0x1dc   :  { %v370_v41 = vadd.f32 1.0, %v664_v40 }
 0x1de   :  { %665 = vrcp.f32 %v370_v41 }
 0x1e8   :  { %v666_v43 = vpop.eup %665 }
 0x1e9   :  { %v373_v44 = vmul.f32 %v666_v43, %v364_v36 }
 0x1eb   :  { %588 = vmatmul.mubr.f32.vlgmr.msra.gmra.mrb[0].mxu1 %v373_v44 }
 0x2be   :  { %v463_v45 = vpop.f32.mrb[0].mxu1 }
 0x2bf   :  { %v464_v46 = vadd.f32 %v485_v5, %v463_v45  ;;  %v589_v47 = vpop.f32.mrb[1].mxu1 }
 0x2c1   :  { %467 = vst [vmem:[%s846_s5] sm:$0xff] %v464_v46 }
 0x2c2   :  { %472 = vsyncpa [#allocation3], 1 }
 0x2c3   :  { %473 = vsyncpa [#allocation5], 1 }

</bundles_post_ra>
